<compile_context>
chip_gen: v5e
topology: v5e:2x2
jax: 0.10.0
libtpu: 0.0.40
codegen_flags: <defaults>
</compile_context>

<pallas_src>
import jax
import jax.numpy as jnp
from jax.experimental import pallas as pl
from jax.experimental.pallas import tpu as pltpu

BN_EPS = 1e-5
LANE = 128              # TPU lane width
ROW_ALIGN = 1024        # multi-step tiles rounded to this many batch rows
MAX_TILE_ROWS = 16384   # hard cap on rows per grid step


def _round_up(n, m):
    return ((n + m - 1) // m) * m


def _round_down(n, m):
    return (n // m) * m


def _vmem_capacity_bytes():
    """Physical per-core VMEM; conservative (v7x, 64 MiB) fallback if the query fails."""
    try:
        return int(pltpu.get_tpu_info().vmem_capacity_bytes)
    except Exception:
        return 64 << 20


def _mlp_kernel(x_ref, w1_ref, b1_ref, w2_ref, b2_ref, o_ref):
    # ---- Linear(input_dim, H) + ReLU: batch rows in sublanes (MXU + VPU) ----
    h = jnp.dot(x_ref[...], w1_ref[...], preferred_element_type=jnp.float32)
    h = jnp.maximum(h + b1_ref[...], 0.0)                        # (TB, H)

    # ---- Dropout: identity in eval mode; BatchNorm folded into w2/b2 (wrapper) ----

    # ---- Linear(H, 1) with a lane-dense result:
    # transpose so batch rows land in lanes (XLU), multiply by the BN-folded
    # w2 column and reduce over sublanes (mostly VPU adds) -> (1, TB).  The
    # bias add, sigmoid and store then run on a dense (1, TB) slab (unmasked
    # vector stores) instead of a (TB, 1) column of masked partial stores.
    ht = h.T                                                     # (H, TB)
    logits = jnp.sum(ht * w2_ref[...], axis=0, keepdims=True)    # (1, TB)
    o_ref[...] = jax.nn.sigmoid(logits + b2_ref[...])            # (1, TB)


def collision_classifier(x, params, *, tile_rows=None, use_bf16=False):
    """x: (B, input_dim) float32 -> (B, 1) float32 probabilities (eval mode)."""
    B, D = x.shape
    H = params["w1"].shape[1]

    # Fold inference-mode BatchNorm1d into the second linear (cheap host-side ops).
    s = params["gamma"] * jax.lax.rsqrt(params["var"] + BN_EPS)               # (1, H)
    w2_col = (params["w2"][:, 0] * s[0]).reshape(H, 1)                        # (H, 1)
    b2 = params["b2"] + (params["beta"] - params["mean"] * s) @ params["w2"]  # (1, 1)

    # ---- VMEM-budget-aware batch tile (generation aware) ----
    cap = _vmem_capacity_bytes()                    # 64 MiB on v7x, 128 MiB on v5e/v6e
    vmem_limit = min(cap * 3 // 4, 96 << 20)        # 48 MiB v7x, 96 MiB v5e/v6e
    if tile_rows is None:
        budget = min(cap // 3, 40 << 20)            # ~21 MiB v7x, 40 MiB v5e/v6e
        in_bytes = 2 if use_bf16 else 4
        # per-row bytes: double-buffered x block + hidden activation, its
        # transpose and fusion slack + double-buffered (1, TB) output row.
        per_row = 2 * D * in_bytes + 3 * H * 4 + 2 * 4
        tile_cap = _round_down(max(budget // per_row, ROW_ALIGN), ROW_ALIGN)
        tile_cap = min(tile_cap, MAX_TILE_ROWS)
    else:
        tile_cap = _round_up(int(tile_rows), LANE)

    if B <= tile_cap:
        # Single grid step: tiny pad up to the next multiple of 128 rows only.
        TB = _round_up(B, LANE)
        grid = 1
        xp = x if TB == B else jnp.pad(x, ((0, TB - B), (0, 0)))
    else:
        # Multi-step grid: no host-side pad of x.  The tail block is partially
        # out-of-bounds; its garbage rows (>= B) are sliced off below (each
        # output row depends only on its own input row, so this is safe).
        TB = tile_cap
        grid = pl.cdiv(B, TB)
        xp = x

    w1 = params["w1"]
    if use_bf16:
        # TODO(synk): bf16 path breaks the 1e-5 f32 tolerance (expect ~1e-3);
        # halves x HBM bytes and uses the native bf16 MXU path on v5e/v6e/v7x.
        xp = xp.astype(jnp.bfloat16)
        w1 = w1.astype(jnp.bfloat16)

    out = pl.pallas_call(
        _mlp_kernel,
        out_shape=jax.ShapeDtypeStruct((grid, 1, TB), jnp.float32),
        grid=(grid,),
        in_specs=[
            pl.BlockSpec((TB, D), lambda i: (i, 0)),   # x: pipelined over batch
            pl.BlockSpec((D, H), lambda i: (0, 0)),    # w1: resident in VMEM
            pl.BlockSpec((1, H), lambda i: (0, 0)),    # b1: resident
            pl.BlockSpec((H, 1), lambda i: (0, 0)),    # BN-folded w2 column: resident
            pl.BlockSpec((1, 1), lambda i: (0, 0)),    # BN-folded b2: resident
        ],
        # Lane-dense output: one (1, TB) row of probabilities per grid step.
        out_specs=pl.BlockSpec((None, 1, TB), lambda i: (i, 0, 0)),
        compiler_params=pltpu.CompilerParams(
            dimension_semantics=("parallel",),          # shard steps across TCs (v7x)
            vmem_limit_bytes=int(vmem_limit),
        ),
    )(xp, w1, params["b1"], w2_col, b2)

    return out.reshape(grid * TB, 1)[:B]


def init_params(key, input_dim, hidden_dim=128):
    """Deterministic synthetic parameters (shapes match the PyTorch module)."""
    k1, k2, k3, k4, k5, k6, k7 = jax.random.split(key, 7)
    bound1 = 1.0 / jnp.sqrt(input_dim)
    bound2 = 1.0 / jnp.sqrt(hidden_dim)
    return {
        # Linear(input_dim, hidden): stored as (in, out) = W^T
        "w1": jax.random.uniform(k1, (input_dim, hidden_dim), jnp.float32, -bound1, bound1),
        "b1": jax.random.uniform(k2, (1, hidden_dim), jnp.float32, -bound1, bound1),
        # BatchNorm1d(hidden) affine params + running stats
        "gamma": 1.0 + 0.1 * jax.random.normal(k3, (1, hidden_dim), jnp.float32),
        "beta": 0.1 * jax.random.normal(k4, (1, hidden_dim), jnp.float32),
        "mean": 0.05 * jax.random.normal(k5, (1, hidden_dim), jnp.float32),
        "var": jnp.abs(1.0 + 0.1 * jax.random.normal(k6, (1, hidden_dim), jnp.float32)),
        # Linear(hidden, 1)
        "w2": jax.random.uniform(k7, (hidden_dim, 1), jnp.float32, -bound2, bound2),
        "b2": jnp.full((1, 1), 0.01, jnp.float32),
    }


def reference_forward(x, p):
    """Pure-JAX reference with BatchNorm kept explicit (un-folded)."""
    hp = jax.lax.Precision.HIGHEST
    h = jnp.maximum(jnp.dot(x, p["w1"], precision=hp) + p["b1"], 0.0)
    h = (h - p["mean"]) * jax.lax.rsqrt(p["var"] + BN_EPS) * p["gamma"] + p["beta"]
    return jax.nn.sigmoid(jnp.dot(h, p["w2"], precision=hp) + p["b2"])


if __name__ == "__main__":
    key = jax.random.PRNGKey(0)
    kx, kp, kx2 = jax.random.split(key, 3)

    input_dim, hidden = 32, 128
    params = init_params(kp, input_dim, hidden_dim=hidden)

    # Small single-tile case (typical small-batch usage of the module).
    x_small = jax.random.normal(kx, (8, input_dim), jnp.float32)
    out_small = jax.block_until_ready(collision_classifier(x_small, params))
    ref_small = reference_forward(x_small, params)
    assert out_small.shape == (8, 1)
    assert jnp.allclose(out_small, ref_small, atol=1e-4, rtol=1e-4)

    # Multi-step grid with a partially-valid tail block (no host-side pad of x).
    x_big = jax.random.normal(kx2, (2500, input_dim), jnp.float32)
    out_big = jax.block_until_ready(
        collision_classifier(x_big, params, tile_rows=1024))
    ref_big = reference_forward(x_big, params)
    assert out_big.shape == (2500, 1)
    assert jnp.allclose(out_big, ref_big, atol=1e-4, rtol=1e-4)

    print("KERNEL_OK")
</pallas_src>

<mosaic_0001>
module attributes {stable_mosaic.version = 11 : i64} {
  func.func @_mlp_kernel(%arg0: i32, %arg1: memref<128x32xf32, #tpu.memory_space<vmem>>, %arg2: memref<32x128xf32, #tpu.memory_space<vmem>>, %arg3: memref<1x128xf32, #tpu.memory_space<vmem>>, %arg4: memref<128x1xf32, #tpu.memory_space<vmem>>, %arg5: memref<1x1xf32, #tpu.memory_space<vmem>>, %arg6: memref<1x1x128xf32, #tpu.memory_space<vmem>>) attributes {dimension_semantics = [#tpu.dimension_semantics<parallel>], iteration_bounds = array<i64: 1>, scalar_prefetch = 0 : i64, scratch_operands = 0 : i64, tpu.core_type = #tpu.core_type<tc>, window_params = [{transform_indices = @transform_0, window_bounds = array<i64: 128, 32>}, {pipeline_mode = #tpu.pipeline_mode<synchronous>, transform_indices = @transform_1, window_bounds = array<i64: 32, 128>}, {pipeline_mode = #tpu.pipeline_mode<synchronous>, transform_indices = @transform_2, window_bounds = array<i64: 1, 128>}, {pipeline_mode = #tpu.pipeline_mode<synchronous>, transform_indices = @transform_3, window_bounds = array<i64: 128, 1>}, {pipeline_mode = #tpu.pipeline_mode<synchronous>, transform_indices = @transform_4, window_bounds = array<i64: 1, 1>}, {transform_indices = @transform_5, window_bounds = array<i64: 1, 1, 128>}]} {
    %c0 = arith.constant 0 : index
    %c0_0 = arith.constant 0 : index
    %0 = vector.load %arg1[%c0, %c0_0] : memref<128x32xf32, #tpu.memory_space<vmem>>, vector<128x32xf32>
    %c0_1 = arith.constant 0 : index
    %c0_2 = arith.constant 0 : index
    %1 = vector.load %arg2[%c0_1, %c0_2] : memref<32x128xf32, #tpu.memory_space<vmem>>, vector<32x128xf32>
    %cst = arith.constant dense<0.000000e+00> : vector<128x128xf32>
    %2 = tpu.matmul %0, %1, %cst {dimension_numbers = #tpu.dot_dimension_numbers<[1], [0], [0], [1], [0, 0, 1, 1], [], []>} : vector<128x32xf32>, vector<32x128xf32>, vector<128x128xf32> -> vector<128x128xf32>
    %c0_3 = arith.constant 0 : index
    %c0_4 = arith.constant 0 : index
    %3 = vector.load %arg3[%c0_3, %c0_4] : memref<1x128xf32, #tpu.memory_space<vmem>>, vector<1x128xf32>
    %4 = vector.broadcast %3 : vector<1x128xf32> to vector<128x128xf32>
    %5 = arith.addf %2, %4 : vector<128x128xf32>
    %cst_5 = arith.constant 0.000000e+00 : f32
    %6 = vector.broadcast %cst_5 : f32 to vector<128x128xf32>
    %7 = arith.maximumf %5, %6 : vector<128x128xf32>
    %8 = tpu.transpose %7, [1, 0] : vector<128x128xf32> -> vector<128x128xf32>
    %c0_6 = arith.constant 0 : index
    %c0_7 = arith.constant 0 : index
    %9 = vector.load %arg4[%c0_6, %c0_7] : memref<128x1xf32, #tpu.memory_space<vmem>>, vector<128x1xf32>
    %10 = vector.broadcast %9 : vector<128x1xf32> to vector<128x128xf32>
    %11 = arith.mulf %8, %10 : vector<128x128xf32>
    %cst_8 = arith.constant dense<0.000000e+00> : vector<128xf32>
    %12 = vector.multi_reduction <add>, %11, %cst_8 [0] : vector<128x128xf32> to vector<128xf32>
    %13 = vector.shape_cast %12 : vector<128xf32> to vector<1x128xf32>
    %c0_9 = arith.constant 0 : index
    %c0_10 = arith.constant 0 : index
    %14 = vector.load %arg5[%c0_9, %c0_10] : memref<1x1xf32, #tpu.memory_space<vmem>>, vector<1x1xf32>
    %15 = vector.broadcast %14 : vector<1x1xf32> to vector<1x128xf32>
    %16 = arith.addf %13, %15 : vector<1x128xf32>
    %17 = arith.negf %16 : vector<1x128xf32>
    %18 = math.exp %17 : vector<1x128xf32>
    %cst_11 = arith.constant 1.000000e+00 : f32
    %19 = vector.broadcast %cst_11 : f32 to vector<1x128xf32>
    %20 = arith.addf %19, %18 : vector<1x128xf32>
    %21 = arith.divf %19, %20 : vector<1x128xf32>
    %c0_12 = arith.constant 0 : index
    %c0_13 = arith.constant 0 : index
    %c0_14 = arith.constant 0 : index
    %22 = vector.load %arg6[%c0_12, %c0_13, %c0_14] : memref<1x1x128xf32, #tpu.memory_space<vmem>>, vector<1x1x128xf32>
    %23 = vector.shape_cast %22 : vector<1x1x128xf32> to vector<1x128xf32>
    %24 = vector.shape_cast %21 : vector<1x128xf32> to vector<1x1x128xf32>
    tpu.vector_store %arg6[%c0_12, %c0_13, %c0_14], %24 {strides = array<i32>} : memref<1x1x128xf32, #tpu.memory_space<vmem>>, vector<1x1x128xf32>,
    return
  }
  func.func @transform_0(%arg0: i32) -> (i32, i32) {
    %c0_i32 = arith.constant 0 : i32
    %c0_i32_0 = arith.constant 0 : i32
    return %arg0, %c0_i32 : i32, i32
  }
  func.func @transform_1(%arg0: i32) -> (i32, i32) {
    %c0_i32 = arith.constant 0 : i32
    %c0_i32_0 = arith.constant 0 : i32
    %c0_i32_1 = arith.constant 0 : i32
    return %c0_i32, %c0_i32_0 : i32, i32
  }
  func.func @transform_2(%arg0: i32) -> (i32, i32) {
    %c0_i32 = arith.constant 0 : i32
    %c0_i32_0 = arith.constant 0 : i32
    %c0_i32_1 = arith.constant 0 : i32
    return %c0_i32, %c0_i32_0 : i32, i32
  }
  func.func @transform_3(%arg0: i32) -> (i32, i32) {
    %c0_i32 = arith.constant 0 : i32
    %c0_i32_0 = arith.constant 0 : i32
    %c0_i32_1 = arith.constant 0 : i32
    return %c0_i32, %c0_i32_0 : i32, i32
  }
  func.func @transform_4(%arg0: i32) -> (i32, i32) {
    %c0_i32 = arith.constant 0 : i32
    %c0_i32_0 = arith.constant 0 : i32
    %c0_i32_1 = arith.constant 0 : i32
    return %c0_i32, %c0_i32_0 : i32, i32
  }
  func.func @transform_5(%arg0: i32) -> (i32, i32, i32) {
    %c0_i32 = arith.constant 0 : i32
    %c0_i32_0 = arith.constant 0 : i32
    %c0_i32_1 = arith.constant 0 : i32
    return %arg0, %c0_i32, %c0_i32_0 : i32, i32, i32
  }
}

</mosaic_0001>

<bundles_post_ra>
// kernel: tpu_custom_call.1
= control target key start
LH: loop header
LB: loop body
LE: loop exit
PB: predicated region body
PF: predicated region fallthrough
CT: control target
= control target key end

     0   :  { %s637_s0 = inlined_call_operand.vmem [shape: f32[128,32], index: 0, kind: input, shape index: {}]   ;;  %s638_s1 = inlined_call_operand.vmem [shape: f32[32,128], index: 1, kind: input, shape index: {}]   ;;  %s639_s2 = inlined_call_operand.vmem [shape: f32[1,128], index: 2, kind: input, shape index: {}]   ;;  %s640_s3 = inlined_call_operand.vmem [shape: f32[128,1], index: 3, kind: input, shape index: {}]   ;;  %s641_s4 = inlined_call_operand.<no memory space> [shape: f32[1,1], index: 4, kind: input, shape index: {}]   ;;  %s642_s5 = inlined_call_operand.hbm [shape: f32[1,1,128], index: 5, kind: output, shape index: {}]  }
   0x1   :  { %v10_v0 = vstv %s641_s4 }
   0x2   :  { %11 = vst [vmem:[#allocation2] sm:$0x1] %v10_v0 }
   0x3   :  { %v42_v1 = vld [vmem:[%s638_s1 + $0x18] sm:$0xff]  ;;  %v41_v2 = vld [vmem:[%s638_s1 + $0x10] sm:$0xff]  ;;  %v40_v3 = vld [vmem:[%s638_s1 + $0x8] sm:$0xff]  ;;  %vm47_vm0 = vcmask 261120  }
   0x4   :  { %108 = vmatpush.msra.mxu0 %v42_v1  ;;  %403 = vmatpush.msra.mxu1 %v42_v1  ;;  %v39_v4 = vld [vmem:[%s638_s1] sm:$0xff] }
   0x5   :  { %404 = vmatpush.msra.mxu2 %v42_v1  ;;  %405 = vmatpush.msra.mxu3 %v42_v1  ;;  %v23_v5 = vld [vmem:[%s637_s0] sm:$0xff] }
   0x6   :  { %109 = vmatpush.msra.mxu0 %v41_v2  ;;  %406 = vmatpush.msra.mxu1 %v41_v2  ;;  %v27_v6 = vld [vmem:[%s637_s0 + $0x20] sm:$0xff] }
   0x7   :  { %407 = vmatpush.msra.mxu2 %v41_v2  ;;  %408 = vmatpush.msra.mxu3 %v41_v2  ;;  %v31_v7 = vld [vmem:[%s637_s0 + $0x40] sm:$0xff] }
   0x8   :  { %110 = vmatpush.msra.mxu0 %v40_v3  ;;  %409 = vmatpush.msra.mxu1 %v40_v3  ;;  %v35_v8 = vld [vmem:[%s637_s0 + $0x60] sm:$0xff] }
   0x9   :  { %410 = vmatpush.msra.mxu2 %v40_v3  ;;  %411 = vmatpush.msra.mxu3 %v40_v3 }
   0xa   :  { %111 = vmatpush.msra.mxu0 %v39_v4  ;;  %412 = vmatpush.msra.mxu1 %v39_v4 }
   0xb   :  { %12 = vsyncpa [#allocation4], 0  ;;  %386 = vmatmul.msk.f32.vlgmr.msra.gmra.mxu0 %vm47_vm0, %v23_v5  ;;  %390 = vmatmul.msk.f32.vlgmr.msra.gmra.mxu1 %vm47_vm0, %v27_v6  ;;  %v24_v9 = vld [vmem:[%s637_s0 + $0x8] sm:$0xff]  ;;  %v25_v13 = vld [vmem:[%s637_s0 + $0x10] sm:$0xff]  ;;  %v451_v29 = vmov 0   ;;  %s377_s12 = sshll.u32 %s642_s5, 4  ;;  %s378_s12 = int_to_ptr.hbm [resolvable:$true] %s377_s12 }
   0xc   :  { %413 = vmatpush.msra.mxu2 %v39_v4  ;;  %414 = vmatpush.msra.mxu3 %v39_v4  ;;  %v28_v10 = vld [vmem:[%s637_s0 + $0x28] sm:$0xff]  ;;  %v29_v14 = vld [vmem:[%s637_s0 + $0x30] sm:$0xff]  ;;  %v26_v17 = vld [vmem:[%s637_s0 + $0x18] sm:$0xff] }
   0xd   :  { %394 = vmatmul.msk.f32.vlgmr.msra.gmra.mxu2 %vm47_vm0, %v31_v7  ;;  %398 = vmatmul.msk.f32.vlgmr.msra.gmra.mxu3 %vm47_vm0, %v35_v8  ;;  %v32_v11 = vld [vmem:[%s637_s0 + $0x48] sm:$0xff]  ;;  %v33_v15 = vld [vmem:[%s637_s0 + $0x50] sm:$0xff]  ;;  %v30_v18 = vld [vmem:[%s637_s0 + $0x38] sm:$0xff] }
   0xe   :  { %v36_v12 = vld [vmem:[%s637_s0 + $0x68] sm:$0xff]  ;;  %v37_v16 = vld [vmem:[%s637_s0 + $0x70] sm:$0xff]  ;;  %v34_v19 = vld [vmem:[%s637_s0 + $0x58] sm:$0xff]  ;;  %417 = vset.pattern.permute.xlu1 %v451_v29  ;;  %418 = vset.pattern.permute.xlu2 %v451_v29 }
   0xf   :  { %v38_v20 = vld [vmem:[%s637_s0 + $0x78] sm:$0xff]  ;;  %v565_v21 = vld [vmem:[%s639_s2] ss:$0 sm:$0xff]  ;;  %v210_v34 = vld [vmem:[%s640_s3 + $0x8] sm:$0xff] }
  0x10   :  { %v209_v28 = vld [vmem:[%s640_s3] sm:$0xff]  ;;  %v215_v43 = vld [vmem:[%s640_s3 + $0x30] sm:$0xff]  ;;  %v212_v56 = vld [vmem:[%s640_s3 + $0x18] sm:$0xff] }
  0x11   :  { %227 = vperm.xlu1 %417, %v209_v28   ;;  %v213_v39 = vld [vmem:[%s640_s3 + $0x20] sm:$0xff]  ;;  %v211_v52 = vld [vmem:[%s640_s3 + $0x10] sm:$0xff]  ;;  %v214_v61 = vld [vmem:[%s640_s3 + $0x28] sm:$0xff] }
  0x12   :  { %v217_v47 = vld [vmem:[%s640_s3 + $0x40] sm:$0xff]  ;;  %v219_v53 = vld [vmem:[%s640_s3 + $0x50] sm:$0xff]  ;;  %237 = vperm.xlu2 %418, %v211_v52   ;;  %v216_v2 = vld [vmem:[%s640_s3 + $0x38] sm:$0xff] }
  0x13   :  { %387 = vmatmul.msk.f32.gmra.mxu0 %vm47_vm0, %v24_v9  ;;  %391 = vmatmul.msk.f32.gmra.mxu1 %vm47_vm0, %v28_v10  ;;  %v221_v57 = vld [vmem:[%s640_s3 + $0x60] sm:$0xff]  ;;  %v223_v62 = vld [vmem:[%s640_s3 + $0x70] sm:$0xff]  ;;  %v218_v8 = vld [vmem:[%s640_s3 + $0x48] sm:$0xff] }
  0x14   :  { %v342_v3 = vld [vmem:[#allocation2] sm:$0x1] }
  0x15   :  { %395 = vmatmul.msk.f32.gmra.mxu2 %vm47_vm0, %v32_v11  ;;  %399 = vmatmul.msk.f32.gmra.mxu3 %vm47_vm0, %v36_v12  ;;  %v220_v11 = vld [vmem:[%s640_s3 + $0x58] sm:$0xff] }
  0x19   :  { %232 = vperm.xlu1 %417, %v210_v34  }
  0x1a   :  { %242 = vperm.xlu2 %418, %v212_v56  }
  0x1b   :  { %388 = vmatmul.msk.f32.gmra.mxu0 %vm47_vm0, %v25_v13  ;;  %392 = vmatmul.msk.f32.gmra.mxu1 %vm47_vm0, %v29_v14  ;;  %v222_v14 = vld [vmem:[%s640_s3 + $0x68] sm:$0xff] }
  0x1d   :  { %396 = vmatmul.msk.f32.gmra.mxu2 %vm47_vm0, %v33_v15  ;;  %400 = vmatmul.msk.f32.gmra.mxu3 %vm47_vm0, %v37_v16 }
  0x21   :  { %247 = vperm.xlu1 %417, %v213_v39  }
  0x22   :  { %252 = vperm.xlu2 %418, %v214_v61  }
  0x23   :  { %389 = vmatmul.msk.f32.gmra.mxu0 %vm47_vm0, %v26_v17  ;;  %393 = vmatmul.msk.f32.gmra.mxu1 %vm47_vm0, %v30_v18  ;;  %v224_v18 = vld [vmem:[%s640_s3 + $0x78] sm:$0xff]  ;;  %s452_s3 = smov [#allocation3]  }
  0x24   :  { %s375_s9 = sshll.u32 %s452_s3, 4  ;;  %s376_s9 = int_to_ptr.vmem [resolvable:$true] %s375_s9 }
  0x25   :  { %397 = vmatmul.msk.f32.gmra.mxu2 %vm47_vm0, %v34_v19  ;;  %401 = vmatmul.msk.f32.gmra.mxu3 %vm47_vm0, %v38_v20 }
  0x29   :  { %257 = vperm.xlu1 %417, %v215_v43  }
  0x2a   :  { %262 = vperm.xlu2 %418, %v216_v2  }
  0x31   :  { %267 = vperm.xlu1 %417, %v217_v47  }
  0x32   :  { %272 = vperm.xlu2 %418, %v218_v8  }
  0x39   :  { %277 = vperm.xlu1 %417, %v219_v53  }
  0x3a   :  { %282 = vperm.xlu2 %418, %v220_v11  }
  0x41   :  { %287 = vperm.xlu1 %417, %v221_v57  }
  0x42   :  { %292 = vperm.xlu2 %418, %v222_v14  }
  0x49   :  { %297 = vperm.xlu1 %417, %v223_v62  }
  0x4a   :  { %302 = vperm.xlu2 %418, %v224_v18  }
  0x51   :  { %345 = vperm.xlu1 %417, %v342_v3  }
  0x88   :  { %v113_v22 = vpop.f32.mrf.mxu0  ;;  %v125_v33 = vpop.f32.mrf.mxu1 }
  0x89   :  { %v114_v23 = vadd.f32 %v565_v21, %v113_v22  ;;  %v126_v38 = vadd.f32 %v565_v21, %v125_v33  ;;  %v238_v33 = vpop.permute.xlu2 %237 }
  0x8b   :  { %v161_v24 = vmax.f32 %v114_v23, 0.0  ;;  %v165_v41 = vmax.f32 %v126_v38, 0.0 }
  0x8d   :  { %177 = vxpose.xlu0.b32.start [1/16] %v161_v24, 128 }
  0x90   :  { %v116_v25 = vpop.f32.mrf.mxu0  ;;  %v128_v40 = vpop.f32.mrf.mxu1 }
  0x91   :  { %v117_v26 = vadd.f32 %v565_v21, %v116_v25  ;;  %v129_v42 = vadd.f32 %v565_v21, %v128_v40  ;;  %v137_v50 = vpop.f32.mrf.mxu2  ;;  %v149_v6 = vpop.f32.mrf.mxu3 }
  0x92   :  { %v138_v55 = vadd.f32 %v565_v21, %v137_v50  ;;  %v150_v10 = vadd.f32 %v565_v21, %v149_v6  ;;  %v228_v25 = vpop.permute.xlu1 %227 }
  0x93   :  { %v162_v27 = vmax.f32 %v117_v26, 0.0  ;;  %v166_v45 = vmax.f32 %v129_v42, 0.0 }
  0x94   :  { %v169_v59 = vmax.f32 %v138_v55, 0.0  ;;  %v173_v13 = vmax.f32 %v150_v10, 0.0 }
  0x95   :  { %178 = vxpose.xlu0.b32.cont [2/16] %v162_v27, 128 }
  0x98   :  { %v119_v30 = vpop.f32.mrf.mxu0  ;;  %v131_v44 = vpop.f32.mrf.mxu1 }
  0x99   :  { %v120_v31 = vadd.f32 %v565_v21, %v119_v30  ;;  %v132_v46 = vadd.f32 %v565_v21, %v131_v44  ;;  %v140_v58 = vpop.f32.mrf.mxu2  ;;  %v152_v12 = vpop.f32.mrf.mxu3 }
  0x9a   :  { %v141_v60 = vadd.f32 %v565_v21, %v140_v58  ;;  %v153_v15 = vadd.f32 %v565_v21, %v152_v12  ;;  %v233_v27 = vpop.permute.xlu1 %232 }
  0x9b   :  { %v163_v32 = vmax.f32 %v120_v31, 0.0  ;;  %v167_v48 = vmax.f32 %v132_v46, 0.0 }
  0x9c   :  { %v170_v0 = vmax.f32 %v141_v60, 0.0  ;;  %v174_v17 = vmax.f32 %v153_v15, 0.0 }
  0x9d   :  { %179 = vxpose.xlu0.b32.cont [3/16] %v163_v32, 128 }
  0xa0   :  { %v122_v35 = vpop.f32.mrf.mxu0  ;;  %v134_v49 = vpop.f32.mrf.mxu1 }
  0xa1   :  { %v123_v36 = vadd.f32 %v565_v21, %v122_v35  ;;  %v135_v51 = vadd.f32 %v565_v21, %v134_v49  ;;  %v143_v63 = vpop.f32.mrf.mxu2  ;;  %v155_v16 = vpop.f32.mrf.mxu3 }
  0xa2   :  { %v144_v1 = vadd.f32 %v565_v21, %v143_v63  ;;  %v156_v19 = vadd.f32 %v565_v21, %v155_v16 }
  0xa3   :  { %v164_v37 = vmax.f32 %v123_v36, 0.0  ;;  %v168_v54 = vmax.f32 %v135_v51, 0.0 }
  0xa4   :  { %v171_v4 = vmax.f32 %v144_v1, 0.0  ;;  %v175_v20 = vmax.f32 %v156_v19, 0.0 }
  0xa5   :  { %180 = vxpose.xlu0.b32.cont [4/16] %v164_v37, 128  ;;  %v243_v37 = vpop.permute.xlu2 %242 }
  0xa9   :  { %v146_v5 = vpop.f32.mrf.mxu2  ;;  %v158_v22 = vpop.f32.mrf.mxu3 }
  0xaa   :  { %v147_v7 = vadd.f32 %v565_v21, %v146_v5  ;;  %v159_v23 = vadd.f32 %v565_v21, %v158_v22 }
  0xac   :  { %v172_v9 = vmax.f32 %v147_v7, 0.0  ;;  %v176_v24 = vmax.f32 %v159_v23, 0.0 }
  0xad   :  { %181 = vxpose.xlu0.b32.cont [5/16] %v165_v41, 128  ;;  %v248_v41 = vpop.permute.xlu1 %247 }
  0xb5   :  { %182 = vxpose.xlu0.b32.cont [6/16] %v166_v45, 128  ;;  %v258_v50 = vpop.permute.xlu1 %257 }
  0xbd   :  { %183 = vxpose.xlu0.b32.cont [7/16] %v167_v48, 128  ;;  %v253_v48 = vpop.permute.xlu2 %252  ;;  %v268_v53 = vpop.permute.xlu1 %267 }
  0xc5   :  { %184 = vxpose.xlu0.b32.cont [8/16] %v168_v54, 128  ;;  %v263_v51 = vpop.permute.xlu2 %262  ;;  %v278_v56 = vpop.permute.xlu1 %277 }
  0xcd   :  { %185 = vxpose.xlu0.b32.cont [9/16] %v169_v59, 128  ;;  %v273_v55 = vpop.permute.xlu2 %272 }
  0xd5   :  { %186 = vxpose.xlu0.b32.cont [10/16] %v170_v0, 128  ;;  %v283_v59 = vpop.permute.xlu2 %282 }
  0xdd   :  { %187 = vxpose.xlu0.b32.cont [11/16] %v171_v4, 128  ;;  %v293_v6 = vpop.permute.xlu2 %292 }
  0xe5   :  { %188 = vxpose.xlu0.b32.cont [12/16] %v172_v9, 128  ;;  %v303_v18 = vpop.permute.xlu2 %302 }
  0xed   :  { %189 = vxpose.xlu0.b32.cont [13/16] %v173_v13, 128 }
  0xf5   :  { %190 = vxpose.xlu0.b32.cont [14/16] %v174_v17, 128 }
  0xfd   :  { %191 = vxpose.xlu0.b32.cont [15/16] %v175_v20, 128 }
 0x105   :  { %192 = vxpose.xlu0.b32.end [16/16] %v176_v24, 128 }
 0x131   :  { %v193_v26 = vpop.trf.xlu0 }
 0x132   :  { %v305_v30 = vmul.f32 %v228_v25, %v193_v26 }
 0x139   :  { %v194_v28 = vpop.trf.xlu0 }
 0x13a   :  { %v306_v31 = vmul.f32 %v233_v27, %v194_v28 }
 0x13c   :  { %v321_v32 = vadd.f32 %v306_v31, %v305_v30 }
 0x141   :  { %v195_v34 = vpop.trf.xlu0 }
 0x142   :  { %v307_v35 = vmul.f32 %v238_v33, %v195_v34 }
 0x144   :  { %v322_v36 = vadd.f32 %v321_v32, %v307_v35 }
 0x149   :  { %v196_v38 = vpop.trf.xlu0 }
 0x14a   :  { %v308_v39 = vmul.f32 %v243_v37, %v196_v38 }
 0x14c   :  { %v323_v40 = vadd.f32 %v322_v36, %v308_v39 }
 0x151   :  { %v197_v42 = vpop.trf.xlu0 }
 0x152   :  { %v309_v21 = vmul.f32 %v248_v41, %v197_v42 }
 0x154   :  { %v324_v43 = vadd.f32 %v323_v40, %v309_v21 }
 0x159   :  { %v198_v44 = vpop.trf.xlu0 }
 0x15a   :  { %v310_v58 = vmul.f32 %v253_v48, %v198_v44 }
 0x15c   :  { %v325_v61 = vadd.f32 %v324_v43, %v310_v58 }
 0x161   :  { %v199_v45 = vpop.trf.xlu0 }
 0x162   :  { %v311_v60 = vmul.f32 %v258_v50, %v199_v45 }
 0x164   :  { %v326_v0 = vadd.f32 %v325_v61, %v311_v60 }
 0x169   :  { %v200_v46 = vpop.trf.xlu0 }
 0x16a   :  { %v312_v62 = vmul.f32 %v263_v51, %v200_v46 }
 0x16c   :  { %419 = vset.pattern.permute.xlu0 %v451_v29  ;;  %v288_v29 = vpop.permute.xlu1 %287  ;;  %v327_v2 = vadd.f32 %v326_v0, %v312_v62 }
 0x171   :  { %v201_v47 = vpop.trf.xlu0 }
 0x172   :  { %v313_v1 = vmul.f32 %v268_v53, %v201_v47 }
 0x174   :  { %v328_v4 = vadd.f32 %v327_v2, %v313_v1  ;;  %v298_v14 = vpop.permute.xlu1 %297 }
 0x179   :  { %v202_v49 = vpop.trf.xlu0 }
 0x17a   :  { %v314_v3 = vmul.f32 %v273_v55, %v202_v49 }
 0x17c   :  { %v329_v7 = vadd.f32 %v328_v4, %v314_v3  ;;  %v346_v28 = vpop.permute.xlu1 %345 }
 0x17d   :  { %v348_v31 = vperm.slane %v346_v28, 0 }
 0x181   :  { %v203_v52 = vpop.trf.xlu0 }
 0x182   :  { %v315_v5 = vmul.f32 %v278_v56, %v203_v52 }
 0x184   :  { %v330_v10 = vadd.f32 %v329_v7, %v315_v5 }
 0x189   :  { %v204_v54 = vpop.trf.xlu0 }
 0x18a   :  { %v316_v8 = vmul.f32 %v283_v59, %v204_v54 }
 0x18c   :  { %v331_v12 = vadd.f32 %v330_v10, %v316_v8 }
 0x191   :  { %v205_v57 = vpop.trf.xlu0 }
 0x192   :  { %v317_v11 = vmul.f32 %v288_v29, %v205_v57 }
 0x194   :  { %v332_v15 = vadd.f32 %v331_v12, %v317_v11 }
 0x199   :  { %v206_v63 = vpop.trf.xlu0 }
 0x19a   :  { %v318_v13 = vmul.f32 %v293_v6, %v206_v63 }
 0x19c   :  { %v333_v17 = vadd.f32 %v332_v15, %v318_v13 }
 0x1a1   :  { %v207_v9 = vpop.trf.xlu0 }
 0x1a2   :  { %v319_v16 = vmul.f32 %v298_v14, %v207_v9 }
 0x1a4   :  { %v334_v20 = vadd.f32 %v333_v17, %v319_v16 }
 0x1a9   :  { %v208_v19 = vpop.trf.xlu0 }
 0x1aa   :  { %v320_v22 = vmul.f32 %v303_v18, %v208_v19 }
 0x1ac   :  { %v335_v23 = vadd.f32 %v334_v20, %v320_v22 }
 0x1ae   :  { %v336_v24 = vrot.slane %v335_v23, 4 }
 0x1b0   :  { %v337_v25 = vadd.f32 %v336_v24, %v335_v23 }
 0x1b2   :  { %v338_v26 = vrot.slane %v337_v25, 2 }
 0x1b4   :  { %v339_v27 = vadd.f32 %v338_v26, %v337_v25 }
 0x1b6   :  { %v340_v30 = vrot.slane %v339_v27, 1 }
 0x1b8   :  { %v341_v32 = vadd.f32 %v340_v30, %v339_v27 }
 0x1ba   :  { %v349_v33 = vadd.f32 %v348_v31, %v341_v32 }
 0x1bc   :  { %v402_v34 = vmul.f32 -1.442695, %v349_v33 }
 0x1be   :  { %421 = vpow2.f32 %v402_v34 }
 0x1c4   :  { %v422_v35 = vpop.eup %421 }
 0x1c5   :  { %v353_v36 = vadd.f32 1.0, %v422_v35 }
 0x1c7   :  { %423 = vrcp.f32 %v353_v36  ;;  %v365_v40 = vand.u32 2147483648, %v353_v36  ;;  %v363_v42 = vand.u32 2147483647, %v353_v36  ;;  %vm359_vm2 = vweird.f32 %v353_v36 }
 0x1c9   :  { %v366_v43 = vor.u32 1.1754944e-38, %v365_v40  ;;  %vm364_vm4 = vcmp.eq.f32.partialorder %v363_v42, 8.507059e+37 }
 0x1cd   :  { %v424_v37 = vpop.eup %423 }
 0x1ce   :  { %v355_v38 = vmul.f32 %v424_v37, %v353_v36  ;;  %vm360_vm1 = vweird.f32 %v424_v37 }
 0x1cf   :  { %vm361_vm3 = vmor %vm359_vm2, %vm360_vm1 }
 0x1d0   :  { %v356_v39 = vsub.f32 1.0, %v355_v38 }
 0x1d2   :  { %v357_v41 = vmul.f32 %v424_v37, %v356_v39 }
 0x1d4   :  { %v358_v21 = vadd.f32 %v424_v37, %v357_v41 }
 0x1d6   :  { %v362_v44 = vsel %vm361_vm3, %v424_v37, %v358_v21 }
 0x1d7   :  { %v367_v45 = vsel %vm364_vm4, %v366_v43, %v362_v44 }
 0x1d8   :  { %369 = vst [vmem:[#allocation3] sm:$0x1] %v367_v45 }
 0x1d9   :  { %380 = dma.vmem_to_hbm [thread:$0]  %s376_s9, 16, %s378_s12, [#allocation4]  }
 0x1da   :  { %449 = dma.done.wait [#allocation4], 16  }
 0x1db   :  { %450 = vsyncadd [#allocation4], 4294967280 }
 0x1dc   :  { %385 = vsyncpa [#allocation4], 1 }

</bundles_post_ra>
